<compile_context>
chip_gen: v7x
topology: tpu7x:2x2x1
jax: 0.10.0
libtpu: 0.0.40
codegen_flags: <defaults>
</compile_context>

<pallas_src>
import functools
import math

import jax
import jax.numpy as jnp
from jax.experimental import pallas as pl
from jax.experimental.pallas import tpu as pltpu


def _round_up(x, m):
    return (x + m - 1) // m * m


def _vmem_capacity_bytes():
    try:
        return int(pltpu.get_tpu_info().vmem_capacity_bytes)
    except Exception:
        return 64 * 2**20          # conservative (v7x per-TensorCore)


def _bspec(shape, index_map, buffer_count=None):
    """BlockSpec with optional pipeline buffer-count (fallback if unsupported)."""
    if buffer_count is not None:
        try:
            return pl.BlockSpec(shape, index_map,
                                pipeline_mode=pl.Buffered(buffer_count))
        except TypeError:
            pass
    return pl.BlockSpec(shape, index_map)


# ----------------------------------------------------------------------------
# Layout helpers (plain JAX glue; fused by XLA with the NCHW boundary transpose)
# ----------------------------------------------------------------------------
def _space_to_depth(x_nhwc, hq, wq):
    """(B, 2*hq, 2*wq, C) -> (B, hq*wq, 4*C); 4C order = (row_phase, col_phase, C)."""
    B = x_nhwc.shape[0]
    C = x_nhwc.shape[-1]
    x = x_nhwc.reshape(B, hq, 2, wq, 2, C)
    x = jnp.transpose(x, (0, 1, 3, 2, 4, 5))
    return x.reshape(B, hq * wq, 4 * C)


def _pack_conv_weights(w_oihw, bias, n_pad):
    """Pack (Cout, Cin, 3, 3) conv weights into 4 phase matmul matrices.

    Returns w_stack (4, 4*Cin, n_pad) bf16 and bias (1, n_pad) f32.  Shift s
    indexes the token read offset {0, +1, +Wq, +Wq+1}; the 4*Cin rows follow the
    (row_phase, col_phase, Cin) order produced by _space_to_depth.
    """
    cout, cin = w_oihw.shape[0], w_oihw.shape[1]
    wt = jnp.transpose(w_oihw, (2, 3, 1, 0))            # (3, 3, Cin, Cout): W[dy, dx]
    z = jnp.zeros((cin, cout), w_oihw.dtype)

    def cat(p00, p01, p10, p11):                        # phase order (r, c)
        return jnp.concatenate([p00, p01, p10, p11], axis=0)   # (4*Cin, Cout)

    w00 = cat(wt[0, 0], wt[0, 1], wt[1, 0], wt[1, 1])   # token (p,   q)
    w01 = cat(wt[0, 2], z,        wt[1, 2], z)          # token (p,   q+1)
    w10 = cat(wt[2, 0], wt[2, 1], z,        z)          # token (p+1, q)
    w11 = cat(wt[2, 2], z,        z,        z)          # token (p+1, q+1)
    w_stack = jnp.stack([w00, w01, w10, w11], axis=0)   # (4, 4*Cin, Cout)
    w_stack = jnp.pad(w_stack, ((0, 0), (0, 0), (0, n_pad - cout)))
    b_pad = jnp.pad(bias, (0, n_pad - cout)).reshape(1, n_pad).astype(jnp.float32)
    return w_stack.astype(jnp.bfloat16), b_pad


def _conv_vmem_bytes(tm, halo, k, n_pad):
    return (2 * (tm + halo) * k * 2        # activation window, double-buffered bf16
            + 4 * k * n_pad * 2            # packed weights, single-buffered bf16
            + n_pad * 4                    # bias f32
            + tm * n_pad * 4               # f32 accumulator scratch
            + 2 * tm * n_pad * 2)          # bf16 output tile, double-buffered


# ----------------------------------------------------------------------------
# Downsample conv kernel: 4 shifted bf16 matmuls, f32 accumulation, fused bias,
# double-buffered activation DMA, bf16 store.
# ----------------------------------------------------------------------------
def _ds_conv_kernel(x_hbm, w_ref, b_ref, o_ref, xbuf, sem, acc_ref, *,
                    tm, wq, mp, halo, tiles):
    b = pl.program_id(0)
    ti = pl.program_id(1)
    slot = ti & 1
    nxt = 1 - slot
    win = tm + halo
    row_cur = pl.multiple_of(b * mp + ti * tm, 16)

    # Prime the pipeline at the start of each batch row.
    @pl.when(ti == 0)
    def _prime():
        pltpu.make_async_copy(x_hbm.at[pl.ds(row_cur, win), :],
                              xbuf.at[slot], sem.at[slot]).start()

    # Prefetch the next window of this batch row (overlaps with the matmuls).
    @pl.when(ti + 1 < tiles)
    def _prefetch():
        row_nxt = pl.multiple_of(row_cur + tm, 16)
        pltpu.make_async_copy(x_hbm.at[pl.ds(row_nxt, win), :],
                              xbuf.at[nxt], sem.at[nxt]).start()

    # Wait only on the window we are about to consume.
    pltpu.make_async_copy(x_hbm.at[pl.ds(row_cur, win), :],
                          xbuf.at[slot], sem.at[slot]).wait()

    acc_ref[...] = jnp.dot(xbuf[slot, pl.ds(0, tm), :], w_ref[0],
                           preferred_element_type=jnp.float32)
    acc_ref[...] += jnp.dot(xbuf[slot, pl.ds(1, tm), :], w_ref[1],
                            preferred_element_type=jnp.float32)
    acc_ref[...] += jnp.dot(xbuf[slot, pl.ds(wq, tm), :], w_ref[2],
                            preferred_element_type=jnp.float32)
    acc_ref[...] += jnp.dot(xbuf[slot, pl.ds(wq + 1, tm), :], w_ref[3],
                            preferred_element_type=jnp.float32)
    o_ref[0] = (acc_ref[...] + b_ref[...]).astype(o_ref.dtype)


def downsample_conv(x_nchw, w_oihw, bias):
    B, C, H, W = x_nchw.shape
    cout = w_oihw.shape[0]
    ho = (H - 2) // 2 + 1                 # output H of conv3x3/stride2 on (0,1,0,1)-padded x
    wo = (W - 2) // 2 + 1
    hq, wq = ho + 1, wo + 1
    k = 4 * C
    n_pad = _round_up(max(cout, 128), 128)      # lane-dense output channels
    m = hq * wq
    halo = _round_up(wq + 1, 16)                # shifted reads need <= wq+1 extra rows

    # Per-generation tile sizing: largest tm whose working set fits the budget.
    cap = _vmem_capacity_bytes()
    budget = int(0.6 * cap)
    m_aligned = _round_up(m, 16)
    best = 16
    for cand in (2048, 1024, 512, 256, 128, 64, 32, 16):
        if _conv_vmem_bytes(cand, halo, k, n_pad) <= budget:
            best = cand
            break
    tm = min(best, m_aligned)
    tiles = (m + tm - 1) // tm
    m_pad = tiles * tm
    mp = m_pad + halo                           # padded rows per batch (16-aligned)

    # Fused transpose + pad + space-to-depth (one activation pass, no 9x im2col).
    x = jnp.transpose(x_nchw, (0, 2, 3, 1))
    x = jnp.pad(x, ((0, 0), (0, 2 * hq - H), (0, 2 * wq - W), (0, 0)))
    tokens = _space_to_depth(x, hq, wq)                           # (B, m, 4C)
    tokens = jnp.pad(tokens, ((0, 0), (0, mp - m), (0, 0)))
    tokens = tokens.astype(jnp.bfloat16).reshape(B * mp, k)       # flat rows, bf16
    w_stack, b_pad = _pack_conv_weights(w_oihw, bias, n_pad)

    need = _conv_vmem_bytes(tm, halo, k, n_pad)
    vmem_limit = int(min(cap, max(32 * 2**20, int(1.2 * need) + (2 << 20))))

    kernel = functools.partial(_ds_conv_kernel, tm=tm, wq=wq, mp=mp,
                               halo=halo, tiles=tiles)
    out = pl.pallas_call(
        kernel,
        out_shape=jax.ShapeDtypeStruct((B, m_pad, n_pad), jnp.bfloat16),
        grid_spec=pltpu.PrefetchScalarGridSpec(
            num_scalar_prefetch=0,
            grid=(B, tiles),
            in_specs=[
                pl.BlockSpec(memory_space=pl.ANY),                 # tokens stay in HBM
                _bspec((4, k, n_pad), lambda b, i: (0, 0, 0), 1),  # weights, single-buffered
                _bspec((1, n_pad), lambda b, i: (0, 0), 1),        # bias, single-buffered
            ],
            out_specs=pl.BlockSpec((1, tm, n_pad), lambda b, i: (b, i, 0)),
            scratch_shapes=[
                pltpu.VMEM((2, tm + halo, k), jnp.bfloat16),       # double-buffered window
                pltpu.SemaphoreType.DMA((2,)),
                pltpu.VMEM((tm, n_pad), jnp.float32),              # f32 accumulator
            ],
        ),
        compiler_params=pltpu.CompilerParams(
            dimension_semantics=("parallel", "arbitrary"),
            vmem_limit_bytes=vmem_limit,
        ),
        cost_estimate=pl.CostEstimate(
            flops=2 * B * tiles * 4 * tm * k * n_pad,
            transcendentals=0,
            bytes_accessed=int(tokens.size * 2 + w_stack.size * 2
                               + B * m_pad * n_pad * 2 + b_pad.size * 4),
        ),
    )(tokens, w_stack, b_pad)

    # Crop stays adjacent to the kernel output so XLA fuses it with the transpose.
    out = out[:, :m, :cout].reshape(B, hq, wq, cout)[:, :ho, :wo, :]
    return jnp.transpose(out, (0, 3, 1, 2)).astype(x_nchw.dtype)


# ----------------------------------------------------------------------------
# avg_pool2d(kernel=2, stride=2): pure VPU 4-phase sum (no MXU), exact f32.
# ----------------------------------------------------------------------------
def _avgpool_kernel(x_ref, o_ref):
    o_ref[0] = 0.25 * (x_ref[0, 0] + x_ref[0, 1] + x_ref[0, 2] + x_ref[0, 3])


def downsample_avgpool(x_nchw):
    B, C, H, W = x_nchw.shape
    ho, wo = H // 2, W // 2
    m = ho * wo

    tm = min(1024, _round_up(m, 8))
    # keep (double-buffered in + out) blocks comfortably under the default VMEM limit
    tm_cap = max(8, ((24 * 2**20) // (40 * C)) // 8 * 8)
    tm = max(8, min(tm, tm_cap))
    tiles = (m + tm - 1) // tm
    m_pad = tiles * tm

    # (B, 4, m, C) phase-major token layout.
    x = jnp.transpose(x_nchw, (0, 2, 3, 1))[:, :2 * ho, :2 * wo, :]
    x = x.reshape(B, ho, 2, wo, 2, C)
    x = jnp.transpose(x, (0, 2, 4, 1, 3, 5)).reshape(B, 4, m, C)
    tokens = jnp.pad(x, ((0, 0), (0, 0), (0, m_pad - m), (0, 0)))

    out = pl.pallas_call(
        _avgpool_kernel,
        out_shape=jax.ShapeDtypeStruct((B, m_pad, C), jnp.float32),
        grid=(B, tiles),
        in_specs=[pl.BlockSpec((1, 4, tm, C), lambda b, i: (b, 0, i, 0))],
        out_specs=pl.BlockSpec((1, tm, C), lambda b, i: (b, i, 0)),
        compiler_params=pltpu.CompilerParams(
            dimension_semantics=("parallel", "parallel")),
    )(tokens)

    out = out[:, :m, :].reshape(B, ho, wo, C)
    return jnp.transpose(out, (0, 3, 1, 2)).astype(x_nchw.dtype)


# ----------------------------------------------------------------------------
# Module-level forward (params is None <=> with_conv=False) and init.
# ----------------------------------------------------------------------------
def downsample_forward(x_nchw, params):
    if params is None:
        return downsample_avgpool(x_nchw)
    return downsample_conv(x_nchw, params["w"], params["b"])


def init_downsample_params(key, in_channels, with_conv):
    if not with_conv:
        return None
    kw, kb = jax.random.split(key)
    bound = 1.0 / math.sqrt(9 * in_channels)
    w = jax.random.uniform(kw, (in_channels, in_channels, 3, 3), jnp.float32, -bound, bound)
    b = jax.random.uniform(kb, (in_channels,), jnp.float32, -bound, bound)
    return {"w": w, "b": b}


# ----------------------------------------------------------------------------
# Pure-JAX references (for correctness verification of the Pallas kernels).
# ----------------------------------------------------------------------------
def _conv_reference(x, w, b):
    xp = jnp.pad(x, ((0, 0), (0, 0), (0, 1), (0, 1)))     # F.pad(x, (0,1,0,1))
    out = jax.lax.conv_general_dilated(
        xp, w, window_strides=(2, 2), padding="VALID",
        dimension_numbers=("NCHW", "OIHW", "NCHW"),
        precision=jax.lax.Precision.HIGHEST)
    return out + b[None, :, None, None]


def _avgpool_reference(x):
    B, C, H, W = x.shape
    ho, wo = H // 2, W // 2
    xr = x[:, :, :2 * ho, :2 * wo].reshape(B, C, ho, 2, wo, 2)
    return xr.mean(axis=(3, 5))


if __name__ == "__main__":
    B, C, H, W = 2, 64, 16, 16
    key = jax.random.PRNGKey(0)
    kx, kp = jax.random.split(key)
    x = jax.random.normal(kx, (B, C, H, W), jnp.float32)

    conv_params = init_downsample_params(kp, C, with_conv=True)
    fwd = jax.jit(downsample_forward)

    out_conv = jax.block_until_ready(fwd(x, conv_params))       # with_conv=True
    out_pool = jax.block_until_ready(fwd(x, None))              # with_conv=False

    assert out_conv.shape == (B, C, H // 2, W // 2), out_conv.shape
    assert out_pool.shape == (B, C, H // 2, W // 2), out_pool.shape
    assert bool(jnp.all(jnp.isfinite(out_conv)))
    assert bool(jnp.all(jnp.isfinite(out_pool)))

    err_conv = float(jnp.max(jnp.abs(
        out_conv - _conv_reference(x, conv_params["w"], conv_params["b"]))))
    err_pool = float(jnp.max(jnp.abs(out_pool - _avgpool_reference(x))))
    assert err_conv < 5e-2, f"conv mismatch: {err_conv}"        # bf16 operand/store tolerance
    assert err_pool < 1e-4, f"avg_pool mismatch: {err_pool}"

    print("KERNEL_OK")
</pallas_src>

<mosaic_0001>
module attributes {stable_mosaic.version = 11 : i64} {
  func.func @_ds_conv_kernel(%arg0: i32, %arg1: i32, %arg2: memref<224x256xbf16, #tpu.memory_space<any>>, %arg3: memref<4x256x128xbf16, #tpu.memory_space<vmem>>, %arg4: memref<1x128xf32, #tpu.memory_space<vmem>>, %arg5: memref<1x96x128xbf16, #tpu.memory_space<vmem>>, %arg6: memref<2x112x256xbf16, #tpu.memory_space<vmem>>, %arg7: memref<2x!tpu.dma_semaphore, #tpu.memory_space<semaphore_mem>>, %arg8: memref<96x128xf32, #tpu.memory_space<vmem>>) attributes {dimension_semantics = [#tpu.dimension_semantics<parallel>, #tpu.dimension_semantics<arbitrary>], iteration_bounds = array<i64: 2, 1>, scalar_prefetch = 0 : i64, scratch_operands = 3 : i64, tpu.core_type = #tpu.core_type<tc>, window_params = [{}, {pipeline_mode = #tpu.pipeline_mode<synchronous>, transform_indices = @transform_1, window_bounds = array<i64: 4, 256, 128>}, {pipeline_mode = #tpu.pipeline_mode<synchronous>, transform_indices = @transform_2, window_bounds = array<i64: 1, 128>}, {transform_indices = @transform_3, window_bounds = array<i64: 1, 96, 128>}]} {
    %c1_i32 = arith.constant 1 : i32
    %0 = arith.andi %arg1, %c1_i32 : i32
    %c1_i32_0 = arith.constant 1 : i32
    %1 = arith.subi %c1_i32_0, %0 : i32
    %c112_i32 = arith.constant 112 : i32
    %2 = arith.muli %arg0, %c112_i32 : i32
    %c96_i32 = arith.constant 96 : i32
    %3 = arith.muli %arg1, %c96_i32 : i32
    %4 = arith.addi %2, %3 : i32
    %5 = tpu.assume_multiple %4, 16 : i32
    %c0_i32 = arith.constant 0 : i32
    %6 = arith.cmpi eq, %arg1, %c0_i32 : i32
    %7 = arith.extui %6 : i1 to i32
    %c0_i32_1 = arith.constant 0 : i32
    %8 = arith.cmpi ne, %7, %c0_i32_1 : i32
    scf.if %8 {
      %c0_i32_46 = arith.constant 0 : i32
      %60 = tpu.memref_slice %arg2[%5, %c0_i32_46] : memref<224x256xbf16, #tpu.memory_space<any>> -> memref<112x256xbf16, #tpu.memory_space<any>>
      %c0_i32_47 = arith.constant 0 : i32
      %c0_i32_48 = arith.constant 0 : i32
      %61 = tpu.memref_slice %arg6[%0, %c0_i32_47, %c0_i32_48] : memref<2x112x256xbf16, #tpu.memory_space<vmem>> -> memref<1x112x256xbf16, #tpu.memory_space<vmem>>
      %62 = tpu.memref_squeeze %61 : memref<1x112x256xbf16, #tpu.memory_space<vmem>> -> memref<112x256xbf16, #tpu.memory_space<vmem>>
      %63 = tpu.memref_slice %arg7[%0] : memref<2x!tpu.dma_semaphore, #tpu.memory_space<semaphore_mem>> -> memref<1x!tpu.dma_semaphore, #tpu.memory_space<semaphore_mem>>
      %64 = tpu.memref_squeeze %63 : memref<1x!tpu.dma_semaphore, #tpu.memory_space<semaphore_mem>> -> memref<!tpu.dma_semaphore, #tpu.memory_space<semaphore_mem>>
      tpu.enqueue_dma source(%60 : memref<112x256xbf16, #tpu.memory_space<any>>) target(%62 : memref<112x256xbf16, #tpu.memory_space<vmem>>) target_semaphore(%64 : memref<!tpu.dma_semaphore, #tpu.memory_space<semaphore_mem>>)
    } else {
    }
    %c1_i32_2 = arith.constant 1 : i32
    %9 = arith.addi %arg1, %c1_i32_2 : i32
    %c1_i32_3 = arith.constant 1 : i32
    %10 = arith.cmpi slt, %9, %c1_i32_3 : i32
    %11 = arith.extui %10 : i1 to i32
    %c0_i32_4 = arith.constant 0 : i32
    %12 = arith.cmpi ne, %11, %c0_i32_4 : i32
    scf.if %12 {
      %c96_i32_46 = arith.constant 96 : i32
      %60 = arith.addi %5, %c96_i32_46 : i32
      %61 = tpu.assume_multiple %60, 16 : i32
      %c0_i32_47 = arith.constant 0 : i32
      %62 = tpu.memref_slice %arg2[%61, %c0_i32_47] : memref<224x256xbf16, #tpu.memory_space<any>> -> memref<112x256xbf16, #tpu.memory_space<any>>
      %c0_i32_48 = arith.constant 0 : i32
      %c0_i32_49 = arith.constant 0 : i32
      %63 = tpu.memref_slice %arg6[%1, %c0_i32_48, %c0_i32_49] : memref<2x112x256xbf16, #tpu.memory_space<vmem>> -> memref<1x112x256xbf16, #tpu.memory_space<vmem>>
      %64 = tpu.memref_squeeze %63 : memref<1x112x256xbf16, #tpu.memory_space<vmem>> -> memref<112x256xbf16, #tpu.memory_space<vmem>>
      %65 = tpu.memref_slice %arg7[%1] : memref<2x!tpu.dma_semaphore, #tpu.memory_space<semaphore_mem>> -> memref<1x!tpu.dma_semaphore, #tpu.memory_space<semaphore_mem>>
      %66 = tpu.memref_squeeze %65 : memref<1x!tpu.dma_semaphore, #tpu.memory_space<semaphore_mem>> -> memref<!tpu.dma_semaphore, #tpu.memory_space<semaphore_mem>>
      tpu.enqueue_dma source(%62 : memref<112x256xbf16, #tpu.memory_space<any>>) target(%64 : memref<112x256xbf16, #tpu.memory_space<vmem>>) target_semaphore(%66 : memref<!tpu.dma_semaphore, #tpu.memory_space<semaphore_mem>>)
    } else {
    }
    %c0_i32_5 = arith.constant 0 : i32
    %13 = tpu.memref_slice %arg2[%5, %c0_i32_5] : memref<224x256xbf16, #tpu.memory_space<any>> -> memref<112x256xbf16, #tpu.memory_space<any>>
    %c0_i32_6 = arith.constant 0 : i32
    %c0_i32_7 = arith.constant 0 : i32
    %14 = tpu.memref_slice %arg6[%0, %c0_i32_6, %c0_i32_7] : memref<2x112x256xbf16, #tpu.memory_space<vmem>> -> memref<1x112x256xbf16, #tpu.memory_space<vmem>>
    %15 = tpu.memref_squeeze %14 : memref<1x112x256xbf16, #tpu.memory_space<vmem>> -> memref<112x256xbf16, #tpu.memory_space<vmem>>
    %16 = tpu.memref_slice %arg7[%0] : memref<2x!tpu.dma_semaphore, #tpu.memory_space<semaphore_mem>> -> memref<1x!tpu.dma_semaphore, #tpu.memory_space<semaphore_mem>>
    %17 = tpu.memref_squeeze %16 : memref<1x!tpu.dma_semaphore, #tpu.memory_space<semaphore_mem>> -> memref<!tpu.dma_semaphore, #tpu.memory_space<semaphore_mem>>
    tpu.wait_dma2 semaphore(%17 : memref<!tpu.dma_semaphore, #tpu.memory_space<semaphore_mem>>) src(%13 : memref<112x256xbf16, #tpu.memory_space<any>>) dst(%15 : memref<112x256xbf16, #tpu.memory_space<vmem>>)
    %18 = arith.index_cast %0 : i32 to index
    %c0 = arith.constant 0 : index
    %c0_8 = arith.constant 0 : index
    %19 = vector.load %arg6[%18, %c0, %c0_8] : memref<2x112x256xbf16, #tpu.memory_space<vmem>>, vector<1x96x256xbf16>
    %20 = vector.shape_cast %19 : vector<1x96x256xbf16> to vector<96x256xbf16>
    %c0_9 = arith.constant 0 : index
    %c0_10 = arith.constant 0 : index
    %c0_11 = arith.constant 0 : index
    %21 = vector.load %arg3[%c0_9, %c0_10, %c0_11] : memref<4x256x128xbf16, #tpu.memory_space<vmem>>, vector<1x256x128xbf16>
    %22 = vector.shape_cast %21 : vector<1x256x128xbf16> to vector<256x128xbf16>
    %cst = arith.constant dense<0.000000e+00> : vector<96x128xf32>
    %23 = tpu.matmul %20, %22, %cst {dimension_numbers = #tpu.dot_dimension_numbers<[1], [0], [0], [1], [0, 0, 1, 1], [], []>} : vector<96x256xbf16>, vector<256x128xbf16>, vector<96x128xf32> -> vector<96x128xf32>
    %c0_12 = arith.constant 0 : index
    %c0_13 = arith.constant 0 : index
    %24 = vector.load %arg8[%c0_12, %c0_13] : memref<96x128xf32, #tpu.memory_space<vmem>>, vector<96x128xf32>
    tpu.vector_store %arg8[%c0_12, %c0_13], %23 {strides = array<i32>} : memref<96x128xf32, #tpu.memory_space<vmem>>, vector<96x128xf32>,
    %c0_14 = arith.constant 0 : index
    %c0_15 = arith.constant 0 : index
    %25 = vector.load %arg8[%c0_14, %c0_15] : memref<96x128xf32, #tpu.memory_space<vmem>>, vector<96x128xf32>
    %26 = arith.index_cast %0 : i32 to index
    %c1 = arith.constant 1 : index
    %c0_16 = arith.constant 0 : index
    %27 = vector.load %arg6[%26, %c1, %c0_16] : memref<2x112x256xbf16, #tpu.memory_space<vmem>>, vector<1x96x256xbf16>
    %28 = vector.shape_cast %27 : vector<1x96x256xbf16> to vector<96x256xbf16>
    %c1_17 = arith.constant 1 : index
    %c0_18 = arith.constant 0 : index
    %c0_19 = arith.constant 0 : index
    %29 = vector.load %arg3[%c1_17, %c0_18, %c0_19] : memref<4x256x128xbf16, #tpu.memory_space<vmem>>, vector<1x256x128xbf16>
    %30 = vector.shape_cast %29 : vector<1x256x128xbf16> to vector<256x128xbf16>
    %cst_20 = arith.constant dense<0.000000e+00> : vector<96x128xf32>
    %31 = tpu.matmul %28, %30, %cst_20 {dimension_numbers = #tpu.dot_dimension_numbers<[1], [0], [0], [1], [0, 0, 1, 1], [], []>} : vector<96x256xbf16>, vector<256x128xbf16>, vector<96x128xf32> -> vector<96x128xf32>
    %32 = arith.addf %25, %31 : vector<96x128xf32>
    %c0_21 = arith.constant 0 : index
    %c0_22 = arith.constant 0 : index
    %33 = vector.load %arg8[%c0_21, %c0_22] : memref<96x128xf32, #tpu.memory_space<vmem>>, vector<96x128xf32>
    tpu.vector_store %arg8[%c0_21, %c0_22], %32 {strides = array<i32>} : memref<96x128xf32, #tpu.memory_space<vmem>>, vector<96x128xf32>,
    %c0_23 = arith.constant 0 : index
    %c0_24 = arith.constant 0 : index
    %34 = vector.load %arg8[%c0_23, %c0_24] : memref<96x128xf32, #tpu.memory_space<vmem>>, vector<96x128xf32>
    %35 = arith.index_cast %0 : i32 to index
    %c9 = arith.constant 9 : index
    %c0_25 = arith.constant 0 : index
    %36 = vector.load %arg6[%35, %c9, %c0_25] : memref<2x112x256xbf16, #tpu.memory_space<vmem>>, vector<1x96x256xbf16>
    %37 = vector.shape_cast %36 : vector<1x96x256xbf16> to vector<96x256xbf16>
    %c2 = arith.constant 2 : index
    %c0_26 = arith.constant 0 : index
    %c0_27 = arith.constant 0 : index
    %38 = vector.load %arg3[%c2, %c0_26, %c0_27] : memref<4x256x128xbf16, #tpu.memory_space<vmem>>, vector<1x256x128xbf16>
    %39 = vector.shape_cast %38 : vector<1x256x128xbf16> to vector<256x128xbf16>
    %cst_28 = arith.constant dense<0.000000e+00> : vector<96x128xf32>
    %40 = tpu.matmul %37, %39, %cst_28 {dimension_numbers = #tpu.dot_dimension_numbers<[1], [0], [0], [1], [0, 0, 1, 1], [], []>} : vector<96x256xbf16>, vector<256x128xbf16>, vector<96x128xf32> -> vector<96x128xf32>
    %41 = arith.addf %34, %40 : vector<96x128xf32>
    %c0_29 = arith.constant 0 : index
    %c0_30 = arith.constant 0 : index
    %42 = vector.load %arg8[%c0_29, %c0_30] : memref<96x128xf32, #tpu.memory_space<vmem>>, vector<96x128xf32>
    tpu.vector_store %arg8[%c0_29, %c0_30], %41 {strides = array<i32>} : memref<96x128xf32, #tpu.memory_space<vmem>>, vector<96x128xf32>,
    %c0_31 = arith.constant 0 : index
    %c0_32 = arith.constant 0 : index
    %43 = vector.load %arg8[%c0_31, %c0_32] : memref<96x128xf32, #tpu.memory_space<vmem>>, vector<96x128xf32>
    %44 = arith.index_cast %0 : i32 to index
    %c10 = arith.constant 10 : index
    %c0_33 = arith.constant 0 : index
    %45 = vector.load %arg6[%44, %c10, %c0_33] : memref<2x112x256xbf16, #tpu.memory_space<vmem>>, vector<1x96x256xbf16>
    %46 = vector.shape_cast %45 : vector<1x96x256xbf16> to vector<96x256xbf16>
    %c3 = arith.constant 3 : index
    %c0_34 = arith.constant 0 : index
    %c0_35 = arith.constant 0 : index
    %47 = vector.load %arg3[%c3, %c0_34, %c0_35] : memref<4x256x128xbf16, #tpu.memory_space<vmem>>, vector<1x256x128xbf16>
    %48 = vector.shape_cast %47 : vector<1x256x128xbf16> to vector<256x128xbf16>
    %cst_36 = arith.constant dense<0.000000e+00> : vector<96x128xf32>
    %49 = tpu.matmul %46, %48, %cst_36 {dimension_numbers = #tpu.dot_dimension_numbers<[1], [0], [0], [1], [0, 0, 1, 1], [], []>} : vector<96x256xbf16>, vector<256x128xbf16>, vector<96x128xf32> -> vector<96x128xf32>
    %50 = arith.addf %43, %49 : vector<96x128xf32>
    %c0_37 = arith.constant 0 : index
    %c0_38 = arith.constant 0 : index
    %51 = vector.load %arg8[%c0_37, %c0_38] : memref<96x128xf32, #tpu.memory_space<vmem>>, vector<96x128xf32>
    tpu.vector_store %arg8[%c0_37, %c0_38], %50 {strides = array<i32>} : memref<96x128xf32, #tpu.memory_space<vmem>>, vector<96x128xf32>,
    %c0_39 = arith.constant 0 : index
    %c0_40 = arith.constant 0 : index
    %52 = vector.load %arg8[%c0_39, %c0_40] : memref<96x128xf32, #tpu.memory_space<vmem>>, vector<96x128xf32>
    %c0_41 = arith.constant 0 : index
    %c0_42 = arith.constant 0 : index
    %53 = vector.load %arg4[%c0_41, %c0_42] : memref<1x128xf32, #tpu.memory_space<vmem>>, vector<1x128xf32>
    %54 = vector.broadcast %53 : vector<1x128xf32> to vector<96x128xf32>
    %55 = arith.addf %52, %54 : vector<96x128xf32>
    %56 = arith.truncf %55 : vector<96x128xf32> to vector<96x128xbf16>
    %c0_43 = arith.constant 0 : index
    %c0_44 = arith.constant 0 : index
    %c0_45 = arith.constant 0 : index
    %57 = vector.load %arg5[%c0_43, %c0_44, %c0_45] : memref<1x96x128xbf16, #tpu.memory_space<vmem>>, vector<1x96x128xbf16>
    %58 = vector.shape_cast %57 : vector<1x96x128xbf16> to vector<96x128xbf16>
    %59 = vector.shape_cast %56 : vector<96x128xbf16> to vector<1x96x128xbf16>
    tpu.vector_store %arg5[%c0_43, %c0_44, %c0_45], %59 {strides = array<i32>} : memref<1x96x128xbf16, #tpu.memory_space<vmem>>, vector<1x96x128xbf16>,
    return
  }
  func.func @transform_1(%arg0: i32, %arg1: i32) -> (i32, i32, i32) {
    %c0_i32 = arith.constant 0 : i32
    %c0_i32_0 = arith.constant 0 : i32
    %c0_i32_1 = arith.constant 0 : i32
    %c0_i32_2 = arith.constant 0 : i32
    return %c0_i32, %c0_i32_0, %c0_i32_1 : i32, i32, i32
  }
  func.func @transform_2(%arg0: i32, %arg1: i32) -> (i32, i32) {
    %c0_i32 = arith.constant 0 : i32
    %c0_i32_0 = arith.constant 0 : i32
    %c0_i32_1 = arith.constant 0 : i32
    return %c0_i32, %c0_i32_0 : i32, i32
  }
  func.func @transform_3(%arg0: i32, %arg1: i32) -> (i32, i32, i32) {
    %c0_i32 = arith.constant 0 : i32
    %c0_i32_0 = arith.constant 0 : i32
    return %arg0, %arg1, %c0_i32 : i32, i32, i32
  }
}

</mosaic_0001>

<bundles_post_ra>
// kernel: downsample_forward.1
= control target key start
LH: loop header
LB: loop body
LE: loop exit
PB: predicated region body
PF: predicated region fallthrough
CT: control target
= control target key end

     0   :  { %s2678_s12 = smov 0   ;;  %s2680_s13 = smov 0   ;;  %s3164_s0 = inlined_call_operand.vmem [shape: bf16[224,256], index: 0, kind: input, shape index: {}]   ;;  %s3165_s1 = inlined_call_operand.vmem [shape: bf16[4,256,128], index: 1, kind: input, shape index: {}]   ;;  %s3166_s2 = inlined_call_operand.vmem [shape: f32[1,128], index: 2, kind: input, shape index: {}]   ;;  %s3167_s3 = inlined_call_operand.vmem [shape: bf16[2,96,128], index: 3, kind: output, shape index: {}]  }
   0x1   :  { %s2682_s14 = smov 0  }
   0x2 LB: > { %s25_s15 = sadd.s32 1, %s2652_s13  ;;  %p2047_p0 = scmp.ge.s32.totalorder %s2656_s14, 1  ;;  %s2656_s14 = sphi %s2682_s14, %s13_s14   ;;  %s2652_s13 = sphi %s2680_s13, %s3169_s13   ;;  %s2648_s12 = sphi %s2678_s12, %s3168_s12  }
   0x3   : > { %p27_p1 = scmp.ge.s32.totalorder %s25_s15, 2  ;;  %p117_p2 = scmp.lt.s32.totalorder %s2656_s14, 3 }
   0x5   : > { %s3171_s15 = smov (%p27_p1, %s25_s15), 0  ;;  %p118_p3 = pnand %p2047_p0, %p117_p2 }
   0x6   : > { %p139_p4 = scmp.lt.s32.totalorder (!%p118_p3), %s2648_s12, 1  ;;  %s151_s16 = smul.u32 (!%p118_p3), 112, %s2648_s12 }
   0x7   : > { %121 = sbr.rel (%p118_p3) target bundleno = 375 (0x177), region = 28 }
   0x8   : > { %s158_s17 = sshra.s32 (!%p118_p3), %s151_s16, 3 }
   0x9   : > { %s2286_s19 = sshll.u32 (!%p118_p3), %s158_s17, 3 }
   0xa   : > { %s2699_s22 = scalar_lea.vmem (!%p118_p3), %s3164_s0, %s2286_s19 }
   0xb   : > { %v184_v0 = vld [vmem:[%s2699_s22] sm:$0xf] (!%p118_p3)  ;;  %v186_v1 = vld [vmem:[%s2699_s22 + $0x8] sm:$0xf] (!%p118_p3)  ;;  %v188_v2 = vld [vmem:[%s2699_s22 + $0x4] sm:$0xf] (!%p118_p3) }
   0xc   : > { %185 = vst [vmem:[#allocation2] sm:$0xf] (!%p118_p3), %v184_v0  ;;  %187 = vst [vmem:[#allocation2 + $0x4] sm:$0xf] (!%p118_p3), %v186_v1  ;;  %v190_v3 = vld [vmem:[%s2699_s22 + $0xc] sm:$0xff] (!%p118_p3)   ;;  %v198_v6 = vld [vmem:[%s2699_s22 + $0x1c] sm:$0xff] (!%p118_p3)  }
   0xd   : > { %189 = vst [vmem:[#allocation2 + $0x8] sm:$0xf] (!%p118_p3), %v188_v2  ;;  %v194_v4 = vld [vmem:[%s2699_s22 + $0x18] sm:$0xf] (!%p118_p3)  ;;  %v196_v5 = vld [vmem:[%s2699_s22 + $0x14] sm:$0xf] (!%p118_p3) }
   0xe   : > { %s3173_s12 = smov (!%p139_p4, %s2648_s12), 1  ;;  %191 = vst [vmem:[#allocation2 + $0xc] sm:$0xff] %v190_v3   ;;  %195 = vst [vmem:[#allocation2 + $0x14] sm:$0xf] %v194_v4  ;;  %v202_v7 = vld [vmem:[%s2699_s22 + $0x28] sm:$0xf] }
   0xf   : > { %s2543_s18 = smul.u32 48, %s3173_s12  ;;  %197 = vst [vmem:[#allocation2 + $0x18] sm:$0xf] %v196_v5  ;;  %v204_v8 = vld [vmem:[%s2699_s22 + $0x24] sm:$0xf]  ;;  %199 = vst [vmem:[#allocation2 + $0x1c] sm:$0xff] %v198_v6  }
  0x10   : > { %203 = vst [vmem:[#allocation2 + $0x24] sm:$0xf] %v202_v7  ;;  %205 = vst [vmem:[#allocation2 + $0x28] sm:$0xf] %v204_v8  ;;  %v206_v9 = vld [vmem:[%s2699_s22 + $0x2c] sm:$0xff]   ;;  %v214_v12 = vld [vmem:[%s2699_s22 + $0x3c] sm:$0xff]  }
  0x11   : > { %s2704_s25 = scalar_lea.vmem %s3167_s3, %s2543_s18  ;;  %v210_v10 = vld [vmem:[%s2699_s22 + $0x38] sm:$0xf]  ;;  %v212_v11 = vld [vmem:[%s2699_s22 + $0x34] sm:$0xf]  ;;  %207 = vst [vmem:[#allocation2 + $0x2c] sm:$0xff] %v206_v9   ;;  %215 = vst [vmem:[#allocation2 + $0x3c] sm:$0xff] %v214_v12  }
  0x12   : > { %211 = vst [vmem:[#allocation2 + $0x34] sm:$0xf] %v210_v10  ;;  %213 = vst [vmem:[#allocation2 + $0x38] sm:$0xf] %v212_v11  ;;  %v218_v13 = vld [vmem:[%s2699_s22 + $0x48] sm:$0xf] }
  0x13   : > { %v220_v14 = vld [vmem:[%s2699_s22 + $0x44] sm:$0xf]  ;;  %219 = vst [vmem:[#allocation2 + $0x44] sm:$0xf] %v218_v13  ;;  %v222_v15 = vld [vmem:[%s2699_s22 + $0x4c] sm:$0xff]   ;;  %v230_v18 = vld [vmem:[%s2699_s22 + $0x5c] sm:$0xff]  }
  0x14   : > { %221 = vst [vmem:[#allocation2 + $0x48] sm:$0xf] %v220_v14  ;;  %v226_v16 = vld [vmem:[%s2699_s22 + $0x58] sm:$0xf]  ;;  %v228_v17 = vld [vmem:[%s2699_s22 + $0x54] sm:$0xf] }
  0x15   : > { %223 = vst [vmem:[#allocation2 + $0x4c] sm:$0xff] %v222_v15   ;;  %227 = vst [vmem:[#allocation2 + $0x54] sm:$0xf] %v226_v16  ;;  %v234_v19 = vld [vmem:[%s2699_s22 + $0x68] sm:$0xf] }
  0x16   : > { %229 = vst [vmem:[#allocation2 + $0x58] sm:$0xf] %v228_v17  ;;  %v236_v20 = vld [vmem:[%s2699_s22 + $0x64] sm:$0xf]  ;;  %231 = vst [vmem:[#allocation2 + $0x5c] sm:$0xff] %v230_v18  }
  0x17   : > { %235 = vst [vmem:[#allocation2 + $0x64] sm:$0xf] %v234_v19  ;;  %237 = vst [vmem:[#allocation2 + $0x68] sm:$0xf] %v236_v20  ;;  %v238_v21 = vld [vmem:[%s2699_s22 + $0x6c] sm:$0xf] }
  0x18   : > { %239 = vst [vmem:[#allocation2 + $0x6c] sm:$0xf] %v238_v21 }
  0x19   : > { %326 = vsyncadd [#allocation3], 1792 }
  0x1a   : > { %2644 = dma.done.wait [#allocation3], 1792 }
  0x1b   : > { %2645 = vsyncadd [#allocation3], 4294965504  ;;  %v2568_v22 = vld [vmem:[%s3165_s1 + $0x40] sm:$0xff]   ;;  %v2572_v26 = vld [vmem:[%s3165_s1 + $0x48] sm:$0xff]   ;;  %vm802_vm0 = vsmask.f32 7424 }
  0x1c   : > { %v2569_v23 = vld [vmem:[%s3165_s1 + $0xc0] sm:$0xff]   ;;  %2335 = vmatprep.subr.bf16.mxu0 %v2568_v22  ;;  %v2573_v27 = vld [vmem:[%s3165_s1 + $0xc8] sm:$0xff]   ;;  %v2576_v30 = vld [vmem:[%s3165_s1 + $0x50] sm:$0xff]   ;;  %vm1179_vm1 = vsmask.f32 3328  ;;  %vm1590_vm2 = vcmask 1042432  }
  0x1d   : > { %v2570_v24 = vld [vmem:[%s3165_s1] sm:$0xff]   ;;  %2387 = vmatprep.subr.bf16.mxu1 %v2569_v23  ;;  %v2574_v28 = vld [vmem:[%s3165_s1 + $0x8] sm:$0xff]   ;;  %v2577_v31 = vld [vmem:[%s3165_s1 + $0xd0] sm:$0xff]  }
  0x1e   : > { %v2571_v25 = vld [vmem:[%s3165_s1 + $0x80] sm:$0xff]   ;;  %2336 = vmatpush3.bf16.msra.mxu0 %v2570_v24  ;;  %v2575_v29 = vld [vmem:[%s3165_s1 + $0x88] sm:$0xff]   ;;  %v2578_v32 = vld [vmem:[%s3165_s1 + $0x10] sm:$0xff]  }
  0x1f   : > { %2388 = vmatpush3.bf16.msra.mxu1 %v2571_v25  ;;  %2337 = vmatprep.subr.bf16.mxu0 %v2572_v26  ;;  %v2579_v33 = vld [vmem:[%s3165_s1 + $0x90] sm:$0xff]   ;;  %v2580_v34 = vld [vmem:[%s3165_s1 + $0x58] sm:$0xff]   ;;  %v2584_v38 = vld [vmem:[%s3165_s1 + $0x60] sm:$0xff]  }
  0x20   : > { %2389 = vmatprep.subr.bf16.mxu1 %v2573_v27  ;;  %v2581_v35 = vld [vmem:[%s3165_s1 + $0xd8] sm:$0xff]   ;;  %v2585_v39 = vld [vmem:[%s3165_s1 + $0xe0] sm:$0xff]   ;;  %v2588_v42 = vld [vmem:[%s3165_s1 + $0x68] sm:$0xff]  }
  0x21   : > { %v2582_v36 = vld [vmem:[%s3165_s1 + $0x18] sm:$0xff]   ;;  %v2586_v40 = vld [vmem:[%s3165_s1 + $0x20] sm:$0xff]   ;;  %v2589_v43 = vld [vmem:[%s3165_s1 + $0xe8] sm:$0xff]  }
  0x22   : > { %2338 = vmatpush3.bf16.msra.mxu0 %v2574_v28  ;;  %v2583_v37 = vld [vmem:[%s3165_s1 + $0x98] sm:$0xff]   ;;  %v2587_v41 = vld [vmem:[%s3165_s1 + $0xa0] sm:$0xff]   ;;  %v2590_v44 = vld [vmem:[%s3165_s1 + $0x28] sm:$0xff]  }
  0x23   : > { %2390 = vmatpush3.bf16.msra.mxu1 %v2575_v29  ;;  %2339 = vmatprep.subr.bf16.mxu0 %v2576_v30  ;;  %v2591_v45 = vld [vmem:[%s3165_s1 + $0xa8] sm:$0xff]   ;;  %v2592_v46 = vld [vmem:[%s3165_s1 + $0x70] sm:$0xff]   ;;  %v2596_v50 = vld [vmem:[%s3165_s1 + $0x78] sm:$0xff]  }
  0x24   : > { %2391 = vmatprep.subr.bf16.mxu1 %v2577_v31  ;;  %v2593_v47 = vld [vmem:[%s3165_s1 + $0xf0] sm:$0xff]   ;;  %v2597_v51 = vld [vmem:[%s3165_s1 + $0xf8] sm:$0xff]   ;;  %v511_v54 = vld [vmem:[#allocation2 + $0x8] sm:$0xff] }
  0x25   : > { %v2594_v48 = vld [vmem:[%s3165_s1 + $0x30] sm:$0xff]   ;;  %v2598_v52 = vld [vmem:[%s3165_s1 + $0x38] sm:$0xff]   ;;  %v510_v56 = vld [vmem:[#allocation2] sm:$0xff]  ;;  %682 = vmatprep.mubr.bf16.mxu0 %v511_v54  ;;  %v816_v57 = vshrl.u32 %v511_v54, 16  ;;  %v818_v58 = vshll.u32 %v511_v54, 16 }
  0x26   : > { %2340 = vmatpush3.bf16.msra.mxu0 %v2578_v32  ;;  %v2595_v49 = vld [vmem:[%s3165_s1 + $0xb0] sm:$0xff]   ;;  %v2599_v53 = vld [vmem:[%s3165_s1 + $0xb8] sm:$0xff]   ;;  %v2600_v62 = vld [vmem:[%s3165_s1 + $0x140] sm:$0xff]   ;;  %v804_v63 = vshrl.u32 %v510_v56, 16  ;;  %v806_v0 = vshll.u32 %v510_v56, 16 }
  0x27   : > { %2392 = vmatpush3.bf16.msra.mxu1 %v2579_v33  ;;  %2341 = vmatprep.subr.bf16.mxu0 %v2580_v34  ;;  %v2824_v55 = vld [vmem:[#allocation2 + $0x18] sm:$0xff]  ;;  %v2828_v61 = vld [vmem:[#allocation2 + $0x10] sm:$0xff]  ;;  %v2601_v2 = vld [vmem:[%s3165_s1 + $0x100] sm:$0xff]   ;;  %v820_v3 = vrot.slane %v818_v58, 1 }
  0x28   : > { %2393 = vmatprep.subr.bf16.mxu1 %v2581_v35  ;;  %v823_v59 = vshll.u32 %v2824_v55, 16  ;;  %v835_v60 = vshrl.u32 %v2824_v55, 16  ;;  %v811_v1 = vshll.u32 %v2828_v61, 16  ;;  %v808_v5 = vrot.slane %v806_v0, 1  ;;  %v2602_v8 = vld [vmem:[%s3165_s1 + $0x1c0] sm:$0xff]   ;;  %v2604_v13 = vld [vmem:[%s3165_s1 + $0x148] sm:$0xff]  }
  0x29   : > { %v821_v7 = vor.u32 %v820_v3, %v816_v57  ;;  %v2603_v10 = vld [vmem:[%s3165_s1 + $0x180] sm:$0xff]   ;;  %v827_v11 = vshrl.u32 %v2828_v61, 16  ;;  %v2853_v14 = vld [vmem:[#allocation2 + $0x28] sm:$0xff]  ;;  %v2608_v28 = vld [vmem:[%s3165_s1 + $0x150] sm:$0xff]  }
  0x2a   : > { %2342 = vmatpush3.bf16.msra.mxu0 %v2582_v36  ;;  %v825_v4 = vrot.slane %v823_v59, 1  ;;  %v813_v6 = vrot.slane %v811_v1, 1  ;;  %v809_v9 = vor.u32 %v808_v5, %v804_v63  ;;  %v839_v17 = vshll.u32 %v2853_v14, 16  ;;  %v2605_v18 = vld [vmem:[%s3165_s1 + $0x108] sm:$0xff]   ;;  %v2862_v19 = vld [vmem:[#allocation2 + $0x20] sm:$0xff]  ;;  %v2609_v29 = vld [vmem:[%s3165_s1 + $0x110] sm:$0xff]  }
  0x2b   : > { %2394 = vmatpush3.bf16.msra.mxu1 %v2583_v37  ;;  %2343 = vmatprep.subr.bf16.mxu0 %v2584_v38  ;;  %v851_v20 = vshrl.u32 %v2853_v14, 16  ;;  %v831_v23 = vshll.u32 %v2862_v19, 16  ;;  %v2606_v24 = vld [vmem:[%s3165_s1 + $0x1c8] sm:$0xff]   ;;  %v2610_v31 = vld [vmem:[%s3165_s1 + $0x1d0] sm:$0xff]   ;;  %v2891_v32 = vld [vmem:[#allocation2 + $0x38] sm:$0xff]  ;;  %v843_v33 = vshrl.u32 %v2862_v19, 16 }
  0x2c   : > { %2395 = vmatprep.subr.bf16.mxu1 %v2585_v39  ;;  %v826_v12 = vsel %vm802_vm0, %v821_v7, %v825_v4  ;;  %v814_v15 = vsel %vm802_vm0, %v809_v9, %v813_v6  ;;  %v837_v16 = vor.u32 %v835_v60, %v825_v4  ;;  %v841_v21 = vrot.slane %v839_v17, 1  ;;  %v2607_v25 = vld [vmem:[%s3165_s1 + $0x188] sm:$0xff]   ;;  %v2611_v36 = vld [vmem:[%s3165_s1 + $0x190] sm:$0xff]   ;;  %v2616_v54 = vld [vmem:[%s3165_s1 + $0x160] sm:$0xff]  }
  0x2d   : > { %1047 = vmatprep.mubr.bf16.mxu1 %v826_v12  ;;  %v829_v22 = vor.u32 %v827_v11, %v813_v6  ;;  %v833_v27 = vrot.slane %v831_v23, 1  ;;  %v855_v35 = vshll.u32 %v2891_v32, 16  ;;  %v2900_v37 = vld [vmem:[#allocation2 + $0x30] sm:$0xff]  ;;  %v867_v38 = vshrl.u32 %v2891_v32, 16  ;;  %v2619_v63 = vld [vmem:[%s3165_s1 + $0x1a0] sm:$0xff]   ;;  %v2620_v3 = vld [vmem:[%s3165_s1 + $0x168] sm:$0xff]  }
  0x2e   : > { %2344 = vmatpush3.bf16.msra.mxu0 %v2586_v40  ;;  %v842_v26 = vsel %vm802_vm0, %v837_v16, %v841_v21  ;;  %v853_v34 = vor.u32 %v851_v20, %v841_v21  ;;  %v847_v39 = vshll.u32 %v2900_v37, 16  ;;  %v2612_v40 = vld [vmem:[%s3165_s1 + $0x158] sm:$0xff]   ;;  %v1208_v12 = vrot.slane %v835_v60, 4  ;;  %v2622_v16 = vld [vmem:[%s3165_s1 + $0x1e8] sm:$0xff]  }
  0x2f   : > { %2396 = vmatpush3.bf16.msra.mxu1 %v2587_v41  ;;  %2345 = vmatprep.subr.bf16.mxu0 %v2588_v42  ;;  %v834_v30 = vsel %vm802_vm0, %v829_v22, %v833_v27  ;;  %v857_v41 = vrot.slane %v855_v35, 1  ;;  %v2613_v42 = vld [vmem:[%s3165_s1 + $0x118] sm:$0xff]   ;;  %v2624_v22 = vld [vmem:[%s3165_s1 + $0x170] sm:$0xff]  }
  0x30   : > { %2397 = vmatprep.subr.bf16.mxu1 %v2589_v43  ;;  %v845_v43 = vor.u32 %v843_v33, %v833_v27  ;;  %v2955_v4 = vld [vmem:[#allocation2 + $0x58] sm:$0xff]  ;;  %v2626_v27 = vld [vmem:[%s3165_s1 + $0x1f0] sm:$0xff]  }
  0x31   : > { %v887_v7 = vshll.u32 %v2955_v4, 16 }
  0x32   : > { %2346 = vmatpush3.bf16.msra.mxu0 %v2590_v44  ;;  %v849_v44 = vrot.slane %v847_v39, 1 }
  0x33   : > { %2398 = vmatpush3.bf16.msra.mxu1 %v2591_v45  ;;  %2347 = vmatprep.subr.bf16.mxu0 %v2592_v46  ;;  %v2614_v45 = vld [vmem:[%s3165_s1 + $0x1d8] sm:$0xff]   ;;  %v858_v46 = vsel %vm802_vm0, %v853_v34, %v857_v41  ;;  %v767_v34 = vld [vmem:[#allocation2 + $0x60] sm:$0x1] }
  0x34   : > { %2399 = vmatprep.subr.bf16.mxu1 %v2593_v47  ;;  %v2615_v47 = vld [vmem:[%s3165_s1 + $0x198] sm:$0xff]   ;;  %v850_v57 = vsel %vm802_vm0, %v845_v43, %v849_v44 }
  0x35   : > { %v2629_v43 = vld [vmem:[%s3165_s1 + $0x138] sm:$0xff]  }
  0x36   : > { %2348 = vmatpush3.bf16.msra.mxu0 %v2594_v48  ;;  %v2924_v48 = vld [vmem:[#allocation2 + $0x48] sm:$0xff] }
  0x37   : > { %2400 = vmatpush3.bf16.msra.mxu1 %v2595_v49  ;;  %2349 = vmatprep.subr.bf16.mxu0 %v2596_v50  ;;  %v2926_v49 = vld [vmem:[#allocation2 + $0x40] sm:$0xff]  ;;  %v859_v50 = vshrl.u32 %v2900_v37, 16  ;;  %v883_v5 = vshrl.u32 %v2924_v48, 16 }
  0x38   : > { %2401 = vmatprep.subr.bf16.mxu1 %v2597_v51  ;;  %v869_v51 = vor.u32 %v867_v38, %v857_v41 }
  0x39   : > { %v861_v6 = vor.u32 %v859_v50, %v849_v44  ;;  %v2630_v44 = vld [vmem:[%s3165_s1 + $0x1f8] sm:$0xff]  }
  0x3a   : > { %2350 = vmatpush3.bf16.msra.mxu0 %v2598_v52  ;;  %v871_v52 = vshll.u32 %v2924_v48, 16 }
  0x3b   : > { %2402 = vmatpush3.bf16.msra.mxu1 %v2599_v53  ;;  %2439 = vmatprep.subr.bf16.mxu0 %v2600_v62  ;;  %v863_v53 = vshll.u32 %v2926_v49, 16  ;;  %v2618_v62 = vld [vmem:[%s3165_s1 + $0x1e0] sm:$0xff]  }
  0x3c   : > { %2491 = vmatprep.subr.bf16.mxu1 %v2602_v8  ;;  %v873_v58 = vrot.slane %v871_v52, 1  ;;  %v2621_v8 = vld [vmem:[%s3165_s1 + $0x128] sm:$0xff]  }
  0x3d   : > { %683 = vmatmul.mubr.bf16.vlgmr.msra.gmra.mrb[0].mxu0 %v510_v56  ;;  %v2617_v56 = vld [vmem:[%s3165_s1 + $0x120] sm:$0xff]  }
  0x3e   : > { %2440 = vmatpush3.bf16.msra.mxu0 %v2601_v2  ;;  %690 = vmatprep.mubr.bf16.mxu0 %v2824_v55  ;;  %v874_v0 = vsel %vm802_vm0, %v869_v51, %v873_v58  ;;  %v865_v2 = vrot.slane %v863_v53, 1  ;;  %v885_v9 = vor.u32 %v883_v5, %v873_v58  ;;  %v895_v51 = vshll.u32 %v767_v34, 16 }
  0x3f   : > { %1048 = vmatmul.mubr.bf16.vlgmr.msra.gmra.mrb[0].mxu1 %v814_v15  ;;  %2441 = vmatprep.subr.bf16.mxu0 %v2604_v13  ;;  %v889_v13 = vrot.slane %v887_v7, 1  ;;  %v875_v15 = vshrl.u32 %v2926_v49, 16 }
  0x40   : > { %2492 = vmatpush3.bf16.msra.mxu1 %v2603_v10  ;;  %1055 = vmatprep.mubr.bf16.mxu1 %v842_v26  ;;  %v2967_v10 = vld [vmem:[#allocation2 + $0x50] sm:$0xff]  ;;  %v866_v21 = vsel %vm802_vm0, %v861_v6, %v865_v2  ;;  %v899_v26 = vshrl.u32 %v2955_v4, 16  ;;  %v1191_v6 = vrot.slane %v827_v11, 4 }
  0x41   : > { %2493 = vmatprep.subr.bf16.mxu1 %v2606_v24  ;;  %v879_v60 = vshll.u32 %v2967_v10, 16  ;;  %v890_v24 = vsel %vm802_vm0, %v885_v9, %v889_v13  ;;  %v1226_v9 = vrot.slane %v851_v20, 4  ;;  %v1595_v20 = vrot.slane %v2824_v55, 5 }
  0x42   : > { %2442 = vmatpush3.bf16.msra.mxu0 %v2605_v18  ;;  %v2623_v18 = vld [vmem:[%s3165_s1 + $0x1a8] sm:$0xff]   ;;  %v901_v41 = vor.u32 %v899_v26, %v889_v13  ;;  %v1220_v55 = vrot.slane %v831_v23, 5 }
  0x43   : > { %2443 = vmatprep.subr.bf16.mxu0 %v2608_v28  ;;  %v768_v28 = vld [vmem:[#allocation2 + $0x68] sm:$0x1] }
  0x44   : > { %2494 = vmatpush3.bf16.msra.mxu1 %v2607_v25  ;;  %v2625_v25 = vld [vmem:[%s3165_s1 + $0x130] sm:$0xff]  }
  0x45   : > { %691 = vmatmul.mubr.bf16.gmra.mrb[4].mxu0 %v2828_v61  ;;  %2495 = vmatprep.subr.bf16.mxu1 %v2610_v31  ;;  %v2627_v31 = vld [vmem:[%s3165_s1 + $0x1b0] sm:$0xff]  }
  0x46   : > { %698 = vmatprep.mubr.bf16.mxu0 %v2853_v14  ;;  %2444 = vmatpush3.bf16.msra.mxu0 %v2609_v29  ;;  %v1211_v29 = vrot.slane %v823_v59, 5  ;;  %v2628_v59 = vld [vmem:[%s3165_s1 + $0x178] sm:$0xff]  }
  0x47   : > { %1056 = vmatmul.mubr.bf16.gmra.mrb[4].mxu1 %v834_v30  ;;  %2445 = vmatprep.subr.bf16.mxu0 %v2612_v40  ;;  %v903_v30 = vshll.u32 %v768_v28, 16  ;;  %v881_v40 = vrot.slane %v879_v60, 1 }
  0x48   : > { %2496 = vmatpush3.bf16.msra.mxu1 %v2611_v36  ;;  %1063 = vmatprep.mubr.bf16.mxu1 %v858_v46  ;;  %v877_v36 = vor.u32 %v875_v15, %v865_v2  ;;  %v1530_v2 = vld [vmem:[#allocation2 + $0x8] sm:$0xe0] }
  0x49   : > { %2497 = vmatprep.subr.bf16.mxu1 %v2614_v45  ;;  %v2631_v45 = vld [vmem:[%s3165_s1 + $0x1b8] sm:$0xff]  }
  0x4a   : > { %2446 = vmatpush3.bf16.msra.mxu0 %v2613_v42  ;;  %v905_v42 = vrot.slane %v903_v30, 1  ;;  %v882_v46 = vsel %vm802_vm0, %v877_v36, %v881_v40  ;;  %v1217_v36 = vrot.slane %v843_v33, 4 }
  0x4b   : > { %2447 = vmatprep.subr.bf16.mxu0 %v2616_v54  ;;  %v1133_v54 = vld [vmem:[#allocation2 + $0x8] sm:$0xf0] }
  0x4c   : > { %2498 = vmatpush3.bf16.msra.mxu1 %v2615_v47  ;;  %v891_v47 = vshrl.u32 %v2967_v10, 16  ;;  %v906_v58 = vsel %vm802_vm0, %v901_v41, %v905_v42  ;;  %v1247_v41 = vrot.slane %v855_v35, 5  ;;  %v1221_v33 = vor.u32 %v1220_v55, %v1217_v36  ;;  %v1541_v55 = vld [vmem:[#allocation2 + $0x60] sm:$0x1f] }
  0x4d   : > { %699 = vmatmul.mubr.bf16.gmra.mrb[8].mxu0 %v2862_v19  ;;  %2499 = vmatprep.subr.bf16.mxu1 %v2618_v62  ;;  %v1198_v62 = vshrl.u32 %v1133_v54, 16  ;;  %v1238_v35 = vrot.slane %v847_v39, 5 }
  0x4e   : > { %706 = vmatprep.mubr.bf16.mxu0 %v2891_v32  ;;  %2448 = vmatpush3.bf16.msra.mxu0 %v2617_v56  ;;  %v1212_v56 = vor.u32 %v1211_v29, %v1208_v12 }
  0x4f   : > { %1064 = vmatmul.mubr.bf16.gmra.mrb[8].mxu1 %v850_v57  ;;  %2449 = vmatprep.subr.bf16.mxu0 %v2620_v3  ;;  %v1132_v57 = vld [vmem:[#allocation2] sm:$0xf0]  ;;  %v1200_v12 = vrot.slane %v1198_v62, 4 }
  0x50   : > { %1071 = vmatprep.mubr.bf16.mxu1 %v874_v0  ;;  %2500 = vmatpush3.bf16.msra.mxu1 %v2619_v63  ;;  %v1201_v63 = vshll.u32 %v1133_v54, 16  ;;  %v1181_v0 = vshrl.u32 %v1132_v57, 16  ;;  %v1184_v3 = vshll.u32 %v1132_v57, 16  ;;  %v1265_v54 = vrot.slane %v871_v52, 5 }
  0x51   : > { %2501 = vmatprep.subr.bf16.mxu1 %v2622_v16  ;;  %v1603_v57 = vrot.slane %v2891_v32, 5  ;;  %v1256_v52 = vrot.slane %v863_v53, 5  ;;  %v1280_v32 = vrot.slane %v899_v26, 4 }
  0x52   : > { %2450 = vmatpush3.bf16.msra.mxu0 %v2621_v8  ;;  %v1194_v8 = vrot.slane %v811_v1, 5  ;;  %v1203_v13 = vrot.slane %v1201_v63, 5  ;;  %v1183_v16 = vrot.slane %v1181_v0, 4  ;;  %v1186_v11 = vrot.slane %v1184_v3, 5  ;;  %v1145_v3 = vld [vmem:[#allocation2 + $0x68] sm:$0x1f] }
  0x53   : > { %2451 = vmatprep.subr.bf16.mxu0 %v2624_v22  ;;  %v897_v22 = vrot.slane %v895_v51, 1  ;;  %v1283_v0 = vrot.slane %v887_v7, 5  ;;  %v1296_v53 = vshrl.u32 %v1145_v3, 16  ;;  %v1271_v7 = vrot.slane %v891_v47, 4 }
  0x54   : > { %2502 = vmatpush3.bf16.msra.mxu1 %v2623_v18  ;;  %v1229_v18 = vrot.slane %v839_v17, 5  ;;  %v1204_v1 = vor.u32 %v1203_v13, %v1200_v12 }
  0x55   : > { %707 = vmatmul.mubr.bf16.gmra.mrb[12].mxu0 %v2900_v37  ;;  %2503 = vmatprep.subr.bf16.mxu1 %v2626_v27  ;;  %v1195_v27 = vor.u32 %v1194_v8, %v1191_v6  ;;  %v1607_v6 = vrot.slane %v2924_v48, 5  ;;  %v1284_v8 = vor.u32 %v1283_v0, %v1280_v32 }
  0x56   : > { %714 = vmatprep.mubr.bf16.mxu0 %v2924_v48  ;;  %2452 = vmatpush3.bf16.msra.mxu0 %v2625_v25  ;;  %v1187_v25 = vor.u32 %v1186_v11, %v1183_v16  ;;  %v1213_v28 = vsel %vm1179_vm1, %v1204_v1, %v1212_v56  ;;  %v1230_v29 = vor.u32 %v1229_v18, %v1226_v9  ;;  %v1299_v9 = vshll.u32 %v1145_v3, 16 }
  0x57   : > { %1072 = vmatmul.mubr.bf16.gmra.mrb[12].mxu1 %v866_v21  ;;  %2453 = vmatprep.subr.bf16.mxu0 %v2628_v59  ;;  %v893_v21 = vor.u32 %v891_v47, %v881_v40  ;;  %v1244_v59 = vrot.slane %v867_v38, 4  ;;  %v1222_v51 = vsel %vm1179_vm1, %v1195_v27, %v1221_v33  ;;  %v1235_v38 = vrot.slane %v859_v50, 4 }
  0x58   : > { %1079 = vmatprep.mubr.bf16.mxu1 %v890_v24  ;;  %2504 = vmatpush3.bf16.msra.mxu1 %v2627_v31  ;;  %v1594_v24 = vrot.slane %v1530_v2, 5  ;;  %v1529_v31 = vld [vmem:[#allocation2] sm:$0xe0]  ;;  %v1196_v34 = vsel %vm1179_vm1, %v1187_v25, %v1195_v27  ;;  %v1231_v40 = vsel %vm1179_vm1, %v1212_v56, %v1230_v29  ;;  %v1597_v56 = vrot.slane %v2862_v19, 5 }
  0x59   : > { %2505 = vmatprep.subr.bf16.mxu1 %v2630_v44  ;;  %v898_v17 = vsel %vm802_vm0, %v893_v21, %v897_v22  ;;  %v1591_v42 = vrot.slane %v1529_v31, 5  ;;  %v1599_v44 = vrot.slane %v2853_v14, 5  ;;  %v1262_v14 = vrot.slane %v883_v5, 4  ;;  %v1144_v21 = vld [vmem:[#allocation2 + $0x60] sm:$0x1f] }
  0x5a   : > { %2454 = vmatpush3.bf16.msra.mxu0 %v2629_v43  ;;  %v1596_v30 = vsel %vm1590_vm2, %v1594_v24, %v1595_v20  ;;  %v1592_v43 = vrot.slane %v2828_v61, 5  ;;  %v1239_v50 = vor.u32 %v1238_v35, %v1235_v38  ;;  %v1253_v5 = vrot.slane %v875_v15, 4 }
  0x5b   : > { %v1604_v62 = vsel %vm1590_vm2, %v1599_v44, %v1603_v57  ;;  %v1601_v2 = vrot.slane %v2900_v37, 5  ;;  %v1608_v13 = vsel %vm1590_vm2, %v1603_v57, %v1607_v6  ;;  %v1274_v37 = vrot.slane %v879_v60, 5 }
  0x5c   : > { %2506 = vmatpush3.bf16.msra.mxu1 %v2631_v45  ;;  %v1248_v45 = vor.u32 %v1247_v41, %v1244_v59  ;;  %v1593_v23 = vsel %vm1590_vm2, %v1591_v42, %v1592_v43  ;;  %v1598_v39 = vsel %vm1590_vm2, %v1592_v43, %v1597_v56  ;;  %v1240_v63 = vsel %vm1179_vm1, %v1221_v33, %v1239_v50 }
  0x5d   : > { %715 = vmatmul.mubr.bf16.gmra.mrb[16].mxu0 %v2926_v49  ;;  %v1257_v15 = vor.u32 %v1256_v52, %v1253_v5  ;;  %v1602_v12 = vsel %vm1590_vm2, %v1597_v56, %v1601_v2  ;;  %v1298_v16 = vrot.slane %v1296_v53, 4  ;;  %v1301_v18 = vrot.slane %v1299_v9, 5 }
  0x5e   : > { %722 = vmatprep.mubr.bf16.mxu0 %v2955_v4  ;;  %v1249_v61 = vsel %vm1179_vm1, %v1230_v29, %v1248_v45  ;;  %v1605_v22 = vrot.slane %v2926_v49, 5  ;;  %v1611_v11 = vrot.slane %v2955_v4, 5  ;;  %v1275_v1 = vor.u32 %v1274_v37, %v1271_v7 }
  0x5f   : > { %1080 = vmatmul.mubr.bf16.gmra.mrb[16].mxu1 %v882_v46  ;;  %v1600_v46 = vsel %vm1590_vm2, %v1595_v20, %v1599_v44  ;;  %v1258_v26 = vsel %vm1179_vm1, %v1239_v50, %v1257_v15  ;;  %v1287_v24 = vshrl.u32 %v1144_v21, 16  ;;  %v1290_v20 = vshll.u32 %v1144_v21, 16 }
  0x60   : > { %1087 = vmatprep.mubr.bf16.mxu1 %v906_v58  ;;  %v1266_v58 = vor.u32 %v1265_v54, %v1262_v14  ;;  %v1302_v47 = vor.u32 %v1301_v18, %v1298_v16  ;;  %v1606_v25 = vsel %vm1590_vm2, %v1601_v2, %v1605_v22  ;;  %v1612_v60 = vsel %vm1590_vm2, %v1607_v6, %v1611_v11 }
  0x61   : > { %v1276_v27 = vsel %vm1179_vm1, %v1257_v15, %v1275_v1  ;;  %v1289_v29 = vrot.slane %v1287_v24, 4  ;;  %v1609_v4 = vrot.slane %v2967_v10, 5  ;;  %v1613_v59 = vrot.slane %v1541_v55, 5 }
  0x62   : > { %v1267_v19 = vsel %vm1179_vm1, %v1248_v45, %v1266_v58  ;;  %v1285_v48 = vsel %vm1179_vm1, %v1266_v58, %v1284_v8  ;;  %v1303_v49 = vsel %vm1179_vm1, %v1284_v8, %v1302_v47 }
  0x63   : > { %v1614_v41 = vsel %vm1590_vm2, %v1609_v4, %v1613_v59 }
  0x65   : > { %723 = vmatmul.mubr.bf16.gmra.mrb[20].mxu0 %v2967_v10 }
  0x66   : > { %1444 = vmatprep.mubr.bf16.mxu0 %v1213_v28  ;;  %v1542_v28 = vld [vmem:[#allocation2 + $0x68] sm:$0x1f] }
  0x67   : > { %1088 = vmatmul.mubr.bf16.gmra.mrb[20].mxu1 %v898_v17  ;;  %v1292_v17 = vrot.slane %v1290_v20, 5 }
  0x68   : > { %1757 = vmatprep.mubr.bf16.mxu1 %v1596_v30  ;;  %v1615_v30 = vrot.slane %v1542_v28, 5 }
  0x69   : > { %v1293_v31 = vor.u32 %v1292_v17, %v1289_v29 }
  0x6a   : > { %v1616_v36 = vsel %vm1590_vm2, %v1611_v11, %v1615_v30 }
  0x6d   : > { %1445 = vmatmul.mubr.bf16.vlgmr.msra.gmra.mrb[24].mxu0 %v1196_v34  ;;  %v1610_v34 = vsel %vm1590_vm2, %v1605_v22, %v1609_v4 }
  0x6e   : > { %1452 = vmatprep.mubr.bf16.mxu0 %v1231_v40  ;;  %v1294_v40 = vsel %vm1179_vm1, %v1275_v1, %v1293_v31 }
  0x6f   : > { %1758 = vmatmul.mubr.bf16.vlgmr.msra.gmra.mrb[24].mxu1 %v1593_v23 }
  0x70   : > { %1765 = vmatprep.mubr.bf16.mxu1 %v1600_v46 }
  0x75   : > { %1453 = vmatmul.mubr.bf16.gmra.mrb[28].mxu0 %v1222_v51 }
  0x76   : > { %1460 = vmatprep.mubr.bf16.mxu0 %v1249_v61 }
  0x77   : > { %1766 = vmatmul.mubr.bf16.gmra.mrb[28].mxu1 %v1598_v39 }
  0x78   : > { %1773 = vmatprep.mubr.bf16.mxu1 %v1604_v62 }
  0x7d   : > { %1461 = vmatmul.mubr.bf16.gmra.mrb[32].mxu0 %v1240_v63 }
  0x7e   : > { %1468 = vmatprep.mubr.bf16.mxu0 %v1267_v19 }
  0x7f   : > { %1774 = vmatmul.mubr.bf16.gmra.mrb[32].mxu1 %v1602_v12 }
  0x80   : > { %1781 = vmatprep.mubr.bf16.mxu1 %v1608_v13 }
  0x85   : > { %1469 = vmatmul.mubr.bf16.gmra.mrb[36].mxu0 %v1258_v26 }
  0x86   : > { %1476 = vmatprep.mubr.bf16.mxu0 %v1285_v48 }
  0x87   : > { %1782 = vmatmul.mubr.bf16.gmra.mrb[36].mxu1 %v1606_v25 }
  0x88   : > { %1789 = vmatprep.mubr.bf16.mxu1 %v1612_v60 }
  0x8d   : > { %1477 = vmatmul.mubr.bf16.gmra.mrb[40].mxu0 %v1276_v27 }
  0x8e   : > { %1484 = vmatprep.mubr.bf16.mxu0 %v1303_v49 }
  0x8f   : > { %1790 = vmatmul.mubr.bf16.gmra.mrb[40].mxu1 %v1610_v34 }
  0x90   : > { %1797 = vmatprep.mubr.bf16.mxu1 %v1616_v36 }
  0x95   : > { %1485 = vmatmul.mubr.bf16.gmra.mrb[44].mxu0 %v1294_v40 }
  0x97   : > { %1798 = vmatmul.mubr.bf16.gmra.mrb[44].mxu1 %v1614_v41 }
 0x110   : > { %v2351_v42 = vpop.f32.mrb[0].mxu0 }
 0x111   : > { %v2352_v10 = vpop.f32.mrb[1].mxu0 }
 0x112   : > { %v2353_v43 = vadd.f32 %v2352_v10, %v2351_v42  ;;  %v2354_v44 = vpop.f32.mrb[2].mxu0  ;;  %v2403_v23 = vpop.f32.mrb[0].mxu1 }
 0x113   : > { %v2355_v33 = vpop.f32.mrb[3].mxu0  ;;  %v2404_v46 = vpop.f32.mrb[1].mxu1 }
 0x114   : > { %v2356_v45 = vadd.f32 %v2355_v33, %v2354_v44  ;;  %v2405_v51 = vadd.f32 %v2404_v46, %v2403_v23  ;;  %v2406_v38 = vpop.f32.mrb[2].mxu1 }
 0x115   : > { %v2407_v61 = vpop.f32.mrb[3].mxu1 }
 0x116   : > { %v3096_v54 = vadd.f32 %v2405_v51, %v2353_v43  ;;  %v2408_v56 = vadd.f32 %v2407_v61, %v2406_v38 }
 0x118   : > { %v2357_v35 = vpop.f32.mrb[4].mxu0  ;;  %v3098_v39 = vadd.f32 %v2408_v56, %v2356_v45 }
 0x119   : > { %v2358_v14 = vpop.f32.mrb[5].mxu0 }
 0x11a   : > { %v2359_v57 = vadd.f32 %v2358_v14, %v2357_v35  ;;  %v2360_v50 = vpop.f32.mrb[6].mxu0  ;;  %v2409_v63 = vpop.f32.mrb[4].mxu1 }
 0x11b   : > { %v2361_v58 = vpop.f32.mrb[7].mxu0  ;;  %v2410_v5 = vpop.f32.mrb[5].mxu1 }
 0x11c   : > { %v2362_v62 = vadd.f32 %v2361_v58, %v2360_v50  ;;  %v2411_v52 = vadd.f32 %v2410_v5, %v2409_v63  ;;  %v2412_v19 = vpop.f32.mrb[6].mxu1 }
 0x11d   : > { %v2413_v0 = vpop.f32.mrb[7].mxu1 }
 0x11e   : > { %v3100_v3 = vadd.f32 %v2411_v52, %v2359_v57  ;;  %v2414_v6 = vadd.f32 %v2413_v0, %v2412_v19 }
 0x120   : > { %v2363_v32 = vpop.f32.mrb[8].mxu0  ;;  %v3102_v9 = vadd.f32 %v2414_v6, %v2362_v62 }
 0x121   : > { %v2364_v2 = vpop.f32.mrb[9].mxu0 }
 0x122   : > { %v2365_v15 = vadd.f32 %v2364_v2, %v2363_v32  ;;  %v2366_v8 = vpop.f32.mrb[10].mxu0  ;;  %v2415_v13 = vpop.f32.mrb[8].mxu1 }
 0x123   : > { %v2367_v53 = vpop.f32.mrb[11].mxu0  ;;  %v2416_v26 = vpop.f32.mrb[9].mxu1 }
 0x124   : > { %v2368_v12 = vadd.f32 %v2367_v53, %v2366_v8  ;;  %v2417_v7 = vadd.f32 %v2416_v26, %v2415_v13  ;;  %v2418_v37 = vpop.f32.mrb[10].mxu1 }
 0x125   : > { %v2419_v16 = vpop.f32.mrb[11].mxu1 }
 0x126   : > { %v3104_v21 = vadd.f32 %v2417_v7, %v2365_v15  ;;  %v2420_v22 = vadd.f32 %v2419_v16, %v2418_v37 }
 0x128   : > { %v2369_v48 = vpop.f32.mrb[12].mxu0  ;;  %v3106_v20 = vadd.f32 %v2420_v22, %v2368_v12 }
 0x129   : > { %v2370_v18 = vpop.f32.mrb[13].mxu0 }
 0x12a   : > { %v2371_v11 = vadd.f32 %v2370_v18, %v2369_v48  ;;  %v2372_v1 = vpop.f32.mrb[14].mxu0  ;;  %v2421_v25 = vpop.f32.mrb[12].mxu1 }
 0x12b   : > { %v2373_v24 = vpop.f32.mrb[15].mxu0  ;;  %v2422_v60 = vpop.f32.mrb[13].mxu1 }
 0x12c   : > { %v2374_v47 = vadd.f32 %v2373_v24, %v2372_v1  ;;  %v2423_v27 = vadd.f32 %v2422_v60, %v2421_v25  ;;  %v2424_v28 = vpop.f32.mrb[14].mxu1  ;;  %v3125_v1 = vld [vmem:[%s3166_s2] ss:$0 sm:$0xff] }
 0x12d   : > { %v2425_v17 = vpop.f32.mrb[15].mxu1 }
 0x12e   : > { %v3108_v4 = vadd.f32 %v2423_v27, %v2371_v11  ;;  %v2426_v30 = vadd.f32 %v2425_v17, %v2424_v28 }
 0x130   : > { %v2375_v29 = vpop.f32.mrb[16].mxu0  ;;  %v3110_v55 = vadd.f32 %v2426_v30, %v2374_v47 }
 0x131   : > { %v2376_v49 = vpop.f32.mrb[17].mxu0 }
 0x132   : > { %v2377_v31 = vadd.f32 %v2376_v49, %v2375_v29  ;;  %v2378_v34 = vpop.f32.mrb[18].mxu0  ;;  %v2427_v59 = vpop.f32.mrb[16].mxu1 }
 0x133   : > { %v2379_v36 = vpop.f32.mrb[19].mxu0  ;;  %v2428_v41 = vpop.f32.mrb[17].mxu1 }
 0x134   : > { %v2380_v40 = vadd.f32 %v2379_v36, %v2378_v34  ;;  %v2429_v42 = vadd.f32 %v2428_v41, %v2427_v59  ;;  %v2430_v10 = vpop.f32.mrb[18].mxu1 }
 0x135   : > { %v2431_v44 = vpop.f32.mrb[19].mxu1 }
 0x136   : > { %v3112_v45 = vadd.f32 %v2429_v42, %v2377_v31  ;;  %v2432_v23 = vadd.f32 %v2431_v44, %v2430_v10 }
 0x138   : > { %v2381_v43 = vpop.f32.mrb[20].mxu0  ;;  %v3114_v35 = vadd.f32 %v2432_v23, %v2380_v40 }
 0x139   : > { %v2382_v33 = vpop.f32.mrb[21].mxu0 }
 0x13a   : > { %v2383_v46 = vadd.f32 %v2382_v33, %v2381_v43  ;;  %v2384_v51 = vpop.f32.mrb[22].mxu0  ;;  %v2433_v14 = vpop.f32.mrb[20].mxu1 }
 0x13b   : > { %v2385_v38 = vpop.f32.mrb[23].mxu0  ;;  %v2434_v56 = vpop.f32.mrb[21].mxu1 }
 0x13c   : > { %v2386_v61 = vadd.f32 %v2385_v38, %v2384_v51  ;;  %v2435_v57 = vadd.f32 %v2434_v56, %v2433_v14  ;;  %v2436_v50 = vpop.f32.mrb[22].mxu1 }
 0x13d   : > { %v2437_v62 = vpop.f32.mrb[23].mxu1 }
 0x13e   : > { %v3116_v5 = vadd.f32 %v2435_v57, %v2383_v46  ;;  %v2438_v52 = vadd.f32 %v2437_v62, %v2436_v50 }
 0x140   : > { %v2455_v58 = vpop.f32.mrb[24].mxu0  ;;  %v3118_v2 = vadd.f32 %v2438_v52, %v2386_v61 }
 0x141   : > { %v2456_v63 = vpop.f32.mrb[25].mxu0 }
 0x142   : > { %v2457_v19 = vadd.f32 %v2456_v63, %v2455_v58  ;;  %v2458_v32 = vpop.f32.mrb[26].mxu0  ;;  %v2507_v8 = vpop.f32.mrb[24].mxu1 }
 0x143   : > { %v2459_v0 = vpop.f32.mrb[27].mxu0  ;;  %v2508_v12 = vpop.f32.mrb[25].mxu1 }
 0x144   : > { %v1493_v6 = vadd.f32 %v2457_v19, %v3096_v54  ;;  %v2460_v15 = vadd.f32 %v2459_v0, %v2458_v32  ;;  %v2509_v13 = vadd.f32 %v2508_v12, %v2507_v8  ;;  %v2510_v26 = vpop.f32.mrb[26].mxu1 }
 0x145   : > { %v2511_v37 = vpop.f32.mrb[27].mxu1 }
 0x146   : > { %v1494_v53 = vadd.f32 %v2460_v15, %v3098_v39  ;;  %v1806_v16 = vadd.f32 %v2509_v13, %v1493_v6  ;;  %v2512_v18 = vadd.f32 %v2511_v37, %v2510_v26 }
 0x148   : > { %v2461_v7 = vpop.f32.mrb[28].mxu0  ;;  %v1807_v24 = vadd.f32 %v2512_v18, %v1494_v53  ;;  %v1849_v25 = vadd.f32 %v3125_v1, %v1806_v16 }
 0x149   : > { %v2462_v48 = vpop.f32.mrb[29].mxu0 }
 0x14a   : > { %v2463_v22 = vadd.f32 %v2462_v48, %v2461_v7  ;;  %v2464_v11 = vpop.f32.mrb[30].mxu0  ;;  %v1850_v60 = vadd.f32 %v3125_v1, %v1807_v24  ;;  %v2513_v27 = vpop.f32.mrb[28].mxu1 }
 0x14b   : > { %v2465_v54 = vpop.f32.mrb[31].mxu0  ;;  %v2514_v29 = vpop.f32.mrb[29].mxu1 }
 0x14c   : > { %v1495_v39 = vadd.f32 %v2463_v22, %v3100_v3  ;;  %v2466_v47 = vadd.f32 %v2465_v54, %v2464_v11  ;;  %v2303_v17 = vpack.c.bf16 %v1850_v60, %v1849_v25  ;;  %v2515_v49 = vadd.f32 %v2514_v29, %v2513_v27  ;;  %v2516_v30 = vpop.f32.mrb[30].mxu1 }
 0x14d   : > { %v2517_v34 = vpop.f32.mrb[31].mxu1 }
 0x14e   : > { %v1496_v28 = vadd.f32 %v2466_v47, %v3102_v9  ;;  %2304 = vst [vmem:[%s2704_s25] sm:$0xff] %v2303_v17   ;;  %v1808_v40 = vadd.f32 %v2515_v49, %v1495_v39  ;;  %v2518_v59 = vadd.f32 %v2517_v34, %v2516_v30 }
 0x150   : > { %v2467_v31 = vpop.f32.mrb[32].mxu0  ;;  %v1809_v10 = vadd.f32 %v2518_v59, %v1496_v28  ;;  %v1851_v9 = vadd.f32 %v3125_v1, %v1808_v40 }
 0x151   : > { %v2468_v36 = vpop.f32.mrb[33].mxu0 }
 0x152   : > { %v2469_v41 = vadd.f32 %v2468_v36, %v2467_v31  ;;  %v2470_v3 = vpop.f32.mrb[34].mxu0  ;;  %v1852_v33 = vadd.f32 %v3125_v1, %v1809_v10  ;;  %v2519_v23 = vpop.f32.mrb[32].mxu1 }
 0x153   : > { %v2471_v42 = vpop.f32.mrb[35].mxu0  ;;  %v2520_v51 = vpop.f32.mrb[33].mxu1 }
 0x154   : > { %v1497_v43 = vadd.f32 %v2469_v41, %v3104_v21  ;;  %v2472_v44 = vadd.f32 %v2471_v42, %v2470_v3  ;;  %v2308_v38 = vpack.c.bf16 %v1852_v33, %v1851_v9  ;;  %v2521_v61 = vadd.f32 %v2520_v51, %v2519_v23  ;;  %v2522_v14 = vpop.f32.mrb[34].mxu1 }
 0x155   : > { %v2523_v57 = vpop.f32.mrb[35].mxu1 }
 0x156   : > { %v1498_v46 = vadd.f32 %v2472_v44, %v3106_v20  ;;  %2330 = vst [vmem:[%s2704_s25 + $0x8] sm:$0xff] %v2308_v38   ;;  %v1810_v58 = vadd.f32 %v2521_v61, %v1497_v43  ;;  %v2524_v62 = vadd.f32 %v2523_v57, %v2522_v14 }
 0x158   : > { %v2473_v56 = vpop.f32.mrb[36].mxu0  ;;  %v1811_v19 = vadd.f32 %v2524_v62, %v1498_v46  ;;  %v1853_v20 = vadd.f32 %v3125_v1, %v1810_v58 }
 0x159   : > { %v2474_v50 = vpop.f32.mrb[37].mxu0 }
 0x15a   : > { %v2475_v63 = vadd.f32 %v2474_v50, %v2473_v56  ;;  %v2476_v21 = vpop.f32.mrb[38].mxu0  ;;  %v1854_v6 = vadd.f32 %v3125_v1, %v1811_v19  ;;  %v2525_v15 = vpop.f32.mrb[36].mxu1 }
 0x15b   : > { %v2477_v52 = vpop.f32.mrb[39].mxu0  ;;  %v2526_v53 = vpop.f32.mrb[37].mxu1 }
 0x15c   : > { %v1499_v32 = vadd.f32 %v2475_v63, %v3108_v4  ;;  %v2478_v0 = vadd.f32 %v2477_v52, %v2476_v21  ;;  %v2313_v12 = vpack.c.bf16 %v1854_v6, %v1853_v20  ;;  %v2527_v13 = vadd.f32 %v2526_v53, %v2525_v15  ;;  %v2528_v26 = vpop.f32.mrb[38].mxu1 }
 0x15d   : > { %v2529_v37 = vpop.f32.mrb[39].mxu1 }
 0x15e   : > { %v1500_v8 = vadd.f32 %v2478_v0, %v3110_v55  ;;  %2331 = vst [vmem:[%s2704_s25 + $0x10] sm:$0xff] %v2313_v12   ;;  %v1812_v16 = vadd.f32 %v2527_v13, %v1499_v32  ;;  %v2530_v18 = vadd.f32 %v2529_v37, %v2528_v26 }
 0x160   : > { %v2479_v7 = vpop.f32.mrb[40].mxu0  ;;  %v1813_v54 = vadd.f32 %v2530_v18, %v1500_v8  ;;  %v1855_v55 = vadd.f32 %v3125_v1, %v1812_v16 }
 0x161   : > { %v2480_v48 = vpop.f32.mrb[41].mxu0 }
 0x162   : > { %v2481_v22 = vadd.f32 %v2480_v48, %v2479_v7  ;;  %v2482_v4 = vpop.f32.mrb[42].mxu0  ;;  %v1856_v47 = vadd.f32 %v3125_v1, %v1813_v54  ;;  %v2531_v25 = vpop.f32.mrb[40].mxu1 }
 0x163   : > { %v2483_v11 = vpop.f32.mrb[43].mxu0  ;;  %v2532_v27 = vpop.f32.mrb[41].mxu1 }
 0x164   : > { %v1501_v24 = vadd.f32 %v2481_v22, %v3112_v45  ;;  %v2484_v39 = vadd.f32 %v2483_v11, %v2482_v4  ;;  %v2318_v28 = vpack.c.bf16 %v1856_v47, %v1855_v55  ;;  %v2533_v29 = vadd.f32 %v2532_v27, %v2531_v25  ;;  %v2534_v17 = vpop.f32.mrb[42].mxu1 }
 0x165   : > { %v2535_v30 = vpop.f32.mrb[43].mxu1 }
 0x166   : > { %v1502_v60 = vadd.f32 %v2484_v39, %v3114_v35  ;;  %2332 = vst [vmem:[%s2704_s25 + $0x18] sm:$0xff] %v2318_v28   ;;  %v1814_v34 = vadd.f32 %v2533_v29, %v1501_v24  ;;  %v2536_v36 = vadd.f32 %v2535_v30, %v2534_v17 }
 0x168   : > { %v2485_v49 = vpop.f32.mrb[44].mxu0  ;;  %v1815_v41 = vadd.f32 %v2536_v36, %v1502_v60  ;;  %v1857_v35 = vadd.f32 %v3125_v1, %v1814_v34 }
 0x169   : > { %v2486_v31 = vpop.f32.mrb[45].mxu0 }
 0x16a   : > { %v2487_v45 = vadd.f32 %v2486_v31, %v2485_v49  ;;  %v2488_v40 = vpop.f32.mrb[46].mxu0  ;;  %v1858_v10 = vadd.f32 %v3125_v1, %v1815_v41  ;;  %v2537_v43 = vpop.f32.mrb[44].mxu1 }
 0x16b   : > { %v2489_v59 = vpop.f32.mrb[47].mxu0  ;;  %v2538_v9 = vpop.f32.mrb[45].mxu1 }
 0x16c   : > { %v1503_v3 = vadd.f32 %v2487_v45, %v3116_v5  ;;  %v2490_v42 = vadd.f32 %v2489_v59, %v2488_v40  ;;  %v2323_v33 = vpack.c.bf16 %v1858_v10, %v1857_v35  ;;  %v2539_v23 = vadd.f32 %v2538_v9, %v2537_v43  ;;  %v2540_v46 = vpop.f32.mrb[46].mxu1 }
 0x16d   : > { %v2541_v51 = vpop.f32.mrb[47].mxu1 }
 0x16e   : > { %v1504_v44 = vadd.f32 %v2490_v42, %v3118_v2  ;;  %2333 = vst [vmem:[%s2704_s25 + $0x20] sm:$0xff] %v2323_v33   ;;  %v1816_v38 = vadd.f32 %v2539_v23, %v1503_v3  ;;  %v2542_v61 = vadd.f32 %v2541_v51, %v2540_v46 }
 0x170   : > { %v1817_v14 = vadd.f32 %v2542_v61, %v1504_v44  ;;  %v1859_v5 = vadd.f32 %v3125_v1, %v1816_v38 }
 0x172   : > { %v1860_v56 = vadd.f32 %v3125_v1, %v1817_v14 }
 0x174   : > { %v2328_v57 = vpack.c.bf16 %v1860_v56, %v1859_v5 }
 0x176   : > { %2334 = vst [vmem:[%s2704_s25 + $0x28] sm:$0xff] %v2328_v57  }
 0x177 PF: > { %s13_s14 = sadd.s32 1, %s2656_s14   ;;  %s3168_s12 = smov %s2652_s13 }
 0x178   : > { %p10_p5 = scmp.ge.s32.totalorder %s13_s14, 4   ;;  %s3169_s13 = smov %s3171_s15 }
 0x17a   :  { %12 = sbr.rel (!%p10_p5) target bundleno = 2 (0x2), region = 177 }
 0x181   :  { %1951 = vsyncmov [#allocation3] }
 0x184   :  { %s1952_s17 = vpop.sfrf %1951 }
 0x185   :  { %p2284_p6 = scmp.ne.s32.totalorder %s1952_s17, 0 }
 0x187   :  { %1956 = shalt.err (%p2284_p6)  }
 0x188   :  { %1958 = vsyncmov [#allocation3 + $0x1] }
 0x18b   :  { %s1959_s18 = vpop.sfrf %1958 }
 0x18c   :  { %p2285_p7 = scmp.ne.s32.totalorder %s1959_s18, 0 }
 0x18e   :  { %1963 = shalt.err (%p2285_p7)  }

</bundles_post_ra>
